<compile_context>
chip_gen: v5e
topology: v5e:2x2
jax: 0.10.0
libtpu: 0.0.40
codegen_flags: <defaults>
</compile_context>

<pallas_src>
import functools

import jax
import jax.numpy as jnp
from jax.experimental import pallas as pl
from jax.experimental.pallas import tpu as pltpu


def _argmin_l2_kernel(ref_ref, img_ref, idx_ref, val_ref, *,
                      total_pixels, needs_mask):
    """Grid: (B, num_pixel_tiles).  Running argmin over pixel tiles.

    ref_ref: (K, D) f32       -- reference descriptors (constant block)
    img_ref: (1, D, TP) f32   -- one pixel tile of one batch element (pixels on lanes)
    idx_ref: (1, K, 1) int32  -- best-match flat pixel index (resident over pixel axis)
    val_ref: (1, K, 1) f32    -- best partial distance d' = ||x||^2 - 2 r.x
    """
    p = pl.program_id(1)
    tp = img_ref.shape[2]

    @pl.when(p == 0)
    def _():
        val_ref[...] = jnp.full_like(val_ref, jnp.inf)
        idx_ref[...] = jnp.zeros_like(idx_ref)

    ref = ref_ref[...]          # (K, D)
    img = img_ref[0]            # (D, TP)  -- no transpose needed

    # Partial squared L2: d' = ||x||^2 - 2 r.x   (||r||^2 added in wrapper).
    cross = jnp.dot(ref, img, preferred_element_type=jnp.float32)    # (K, TP)  MXU
    img_sq = jnp.sum(img * img, axis=0, keepdims=True)               # (1, TP)
    dist = img_sq - 2.0 * cross                                      # (K, TP)

    if needs_mask:
        # Mask lanes past the true pixel count (only emitted when P % TP != 0).
        lane = jax.lax.broadcasted_iota(jnp.int32, dist.shape, 1) + p * tp
        dist = jnp.where(lane < total_pixels, dist, jnp.inf)

    tile_min = jnp.min(dist, axis=1, keepdims=True)                          # (K, 1)
    tile_arg = (jnp.argmin(dist, axis=1, keepdims=True).astype(jnp.int32)
                + p * tp)                                                    # (K, 1) global flat idx

    cur_val = val_ref[0]        # (K, 1)
    cur_idx = idx_ref[0]        # (K, 1)
    better = tile_min < cur_val  # strict '<' keeps first occurrence (torch tie-break)
    val_ref[0] = jnp.where(better, tile_min, cur_val)
    idx_ref[0] = jnp.where(better, tile_arg, cur_idx)


def _argmin_l2_pallas(ref_descriptors, img_ndp, *, tile_pixels):
    """ref_descriptors: (K, D) f32, img_ndp: (B, D, P) f32 ->
    (best_idx (B, K) int32, best_partial_dist (B, K) f32)."""
    K, D = ref_descriptors.shape
    B, D2, P = img_ndp.shape
    assert D == D2
    assert tile_pixels == P or tile_pixels % 128 == 0, (
        "pixel tile must be the full image or a multiple of 128")

    num_tiles = pl.cdiv(P, tile_pixels)
    needs_mask = (P % tile_pixels) != 0

    kernel = functools.partial(_argmin_l2_kernel,
                               total_pixels=P, needs_mask=needs_mask)

    idx_out, val_out = pl.pallas_call(
        kernel,
        out_shape=(
            jax.ShapeDtypeStruct((B, K, 1), jnp.int32),
            jax.ShapeDtypeStruct((B, K, 1), jnp.float32),
        ),
        grid_spec=pltpu.PrefetchScalarGridSpec(
            num_scalar_prefetch=0,
            grid=(B, num_tiles),
            in_specs=[
                pl.BlockSpec((K, D), lambda b, p: (0, 0)),
                pl.BlockSpec((1, D, tile_pixels), lambda b, p: (b, 0, p)),
            ],
            out_specs=[
                pl.BlockSpec((1, K, 1), lambda b, p: (b, 0, 0)),
                pl.BlockSpec((1, K, 1), lambda b, p: (b, 0, 0)),
            ],
        ),
        compiler_params=pltpu.CompilerParams(
            dimension_semantics=("parallel", "arbitrary")),
    )(ref_descriptors, img_ndp)
    return idx_out.reshape(B, K), val_out.reshape(B, K)


@functools.partial(jax.jit, static_argnames=("tile_pixels",))
def precomputed_descriptor_net_forward(descriptor_image_nchw, ref_descriptors,
                                       tile_pixels=None):
    """Forward pass of PrecomputedDescriptorNet.

    descriptor_image_nchw: (B, D, H, W) float32   (PyTorch NCHW convention)
    ref_descriptors:       (K, D) float32

    Returns dict with:
      'best_match_dict': {'indices': (B, K, 2) int32  (u, v) = (col, row),
                          'best_match_dist': (B, K) float32 squared L2}
      'dynamics_net_input': (B, 2*K) int32 (indices flattened from dim 1)
    """
    B, D, H, W = descriptor_image_nchw.shape
    K, D2 = ref_descriptors.shape
    assert D == D2, "descriptor dim mismatch"
    P = H * W

    # Native layout: NCHW -> (B, D, P) is a free contiguous reshape (no transpose).
    img_ndp = descriptor_image_nchw.reshape(B, D, P).astype(jnp.float32)
    ref_f32 = ref_descriptors.astype(jnp.float32)

    if tile_pixels is None:
        # Whole image per step for small images, 2048 lanes otherwise (masked tail).
        tile_pixels = P if P <= 2048 else 2048

    best_idx, partial_dist = _argmin_l2_pallas(ref_f32, img_ndp,
                                               tile_pixels=tile_pixels)

    # Add the constant ||r||^2 back (dropped from the in-kernel running argmin).
    ref_sq = jnp.sum(ref_f32 * ref_f32, axis=1)                 # (K,)
    best_dist = partial_dist + ref_sq[None, :]                  # (B, K)

    rows = best_idx // W
    cols = best_idx % W
    indices = jnp.stack([cols, rows], axis=-1)                  # (B, K, 2), (u, v)
    dynamics_net_input = indices.reshape(B, -1)                 # flatten(start_dim=1)

    # TODO(synk): for B == 1 on v7x, split the pixel range over a leading
    # parallel grid axis so both TensorCores get work; not needed for B >= 2.
    return {
        "best_match_dict": {"indices": indices, "best_match_dist": best_dist},
        "dynamics_net_input": dynamics_net_input,
    }


def _reference_forward(descriptor_image_nchw, ref_descriptors):
    """Pure-JAX reference for correctness checking."""
    B, D, H, W = descriptor_image_nchw.shape
    img = jnp.transpose(descriptor_image_nchw, (0, 2, 3, 1)).reshape(B, H * W, D)
    diff = ref_descriptors[None, :, None, :] - img[:, None, :, :]   # (B, K, P, D)
    dist = jnp.sum(diff * diff, axis=-1)                            # (B, K, P)
    flat = jnp.argmin(dist, axis=-1).astype(jnp.int32)              # (B, K)
    rows = flat // W
    cols = flat % W
    indices = jnp.stack([cols, rows], axis=-1)
    return indices, jnp.min(dist, axis=-1)


if __name__ == "__main__":
    # Config implied by the module: K ref descriptors of dim D; image (B, D, H, W).
    B, D, H, W, K = 2, 32, 16, 16, 8

    key = jax.random.PRNGKey(0)
    k_ref, k_img = jax.random.split(key)

    # Deterministic "initialize_weights": normal-initialized reference descriptors.
    ref_descriptors = jax.random.normal(k_ref, (K, D), dtype=jnp.float32)
    descriptor_image = jax.random.normal(k_img, (B, D, H, W), dtype=jnp.float32)

    out = precomputed_descriptor_net_forward(descriptor_image, ref_descriptors)
    out = jax.block_until_ready(out)

    # Sanity check against a pure-JAX reference.
    ref_indices, ref_dist = _reference_forward(descriptor_image, ref_descriptors)
    assert out["best_match_dict"]["indices"].shape == (B, K, 2)
    assert out["dynamics_net_input"].shape == (B, 2 * K)
    assert jnp.array_equal(out["best_match_dict"]["indices"], ref_indices)
    assert jnp.allclose(out["best_match_dict"]["best_match_dist"], ref_dist,
                        rtol=1e-4, atol=1e-4)

    print("KERNEL_OK")
</pallas_src>

<mosaic_0001>
module attributes {stable_mosaic.version = 11 : i64} {
  func.func @_argmin_l2_kernel(%arg0: i32, %arg1: i32, %arg2: memref<8x32xf32, #tpu.memory_space<vmem>>, %arg3: memref<1x32x256xf32, #tpu.memory_space<vmem>>, %arg4: memref<1x8x1xi32, #tpu.memory_space<vmem>>, %arg5: memref<1x8x1xf32, #tpu.memory_space<vmem>>) attributes {dimension_semantics = [#tpu.dimension_semantics<parallel>, #tpu.dimension_semantics<arbitrary>], iteration_bounds = array<i64: 2, 1>, scalar_prefetch = 0 : i64, scratch_operands = 0 : i64, tpu.core_type = #tpu.core_type<tc>, window_params = [{pipeline_mode = #tpu.pipeline_mode<synchronous>, transform_indices = @transform_0, window_bounds = array<i64: 8, 32>}, {transform_indices = @transform_1, window_bounds = array<i64: 1, 32, 256>}, {transform_indices = @transform_2, window_bounds = array<i64: 1, 8, 1>}, {transform_indices = @transform_3, window_bounds = array<i64: 1, 8, 1>}]} {
    %c0_i32 = arith.constant 0 : i32
    %0 = arith.cmpi eq, %arg1, %c0_i32 : i32
    %1 = arith.extui %0 : i1 to i32
    %c0_i32_0 = arith.constant 0 : i32
    %2 = arith.cmpi ne, %1, %c0_i32_0 : i32
    scf.if %2 {
      %cst_20 = arith.constant 0x7F800000 : f32
      %34 = vector.broadcast %cst_20 : f32 to vector<1x8x1xf32>
      %c0_21 = arith.constant 0 : index
      %c0_22 = arith.constant 0 : index
      %c0_23 = arith.constant 0 : index
      %35 = vector.load %arg5[%c0_21, %c0_22, %c0_23] : memref<1x8x1xf32, #tpu.memory_space<vmem>>, vector<1x8x1xf32>
      tpu.vector_store %arg5[%c0_21, %c0_22, %c0_23], %34 {strides = array<i32>} : memref<1x8x1xf32, #tpu.memory_space<vmem>>, vector<1x8x1xf32>,
      %c0_i32_24 = arith.constant 0 : i32
      %36 = vector.broadcast %c0_i32_24 : i32 to vector<1x8x1xi32>
      %c0_25 = arith.constant 0 : index
      %c0_26 = arith.constant 0 : index
      %c0_27 = arith.constant 0 : index
      %37 = vector.load %arg4[%c0_25, %c0_26, %c0_27] : memref<1x8x1xi32, #tpu.memory_space<vmem>>, vector<1x8x1xi32>
      tpu.vector_store %arg4[%c0_25, %c0_26, %c0_27], %36 {strides = array<i32>} : memref<1x8x1xi32, #tpu.memory_space<vmem>>, vector<1x8x1xi32>,
    } else {
    }
    %c0 = arith.constant 0 : index
    %c0_1 = arith.constant 0 : index
    %3 = vector.load %arg2[%c0, %c0_1] : memref<8x32xf32, #tpu.memory_space<vmem>>, vector<8x32xf32>
    %c0_2 = arith.constant 0 : index
    %c0_3 = arith.constant 0 : index
    %c0_4 = arith.constant 0 : index
    %4 = vector.load %arg3[%c0_2, %c0_3, %c0_4] : memref<1x32x256xf32, #tpu.memory_space<vmem>>, vector<1x32x256xf32>
    %5 = vector.shape_cast %4 : vector<1x32x256xf32> to vector<32x256xf32>
    %cst = arith.constant dense<0.000000e+00> : vector<8x256xf32>
    %6 = tpu.matmul %3, %5, %cst {dimension_numbers = #tpu.dot_dimension_numbers<[1], [0], [0], [1], [0, 0, 1, 1], [], []>} : vector<8x32xf32>, vector<32x256xf32>, vector<8x256xf32> -> vector<8x256xf32>
    %7 = arith.mulf %5, %5 : vector<32x256xf32>
    %cst_5 = arith.constant dense<0.000000e+00> : vector<256xf32>
    %8 = vector.multi_reduction <add>, %7, %cst_5 [0] : vector<32x256xf32> to vector<256xf32>
    %9 = vector.shape_cast %8 : vector<256xf32> to vector<1x256xf32>
    %cst_6 = arith.constant 2.000000e+00 : f32
    %10 = vector.broadcast %cst_6 : f32 to vector<8x256xf32>
    %11 = arith.mulf %10, %6 : vector<8x256xf32>
    %12 = vector.broadcast %9 : vector<1x256xf32> to vector<8x256xf32>
    %13 = arith.subf %12, %11 : vector<8x256xf32>
    %cst_7 = arith.constant dense<0x7F800000> : vector<8xf32>
    %14 = vector.multi_reduction <minimumf>, %13, %cst_7 [1] : vector<8x256xf32> to vector<8xf32>
    %15 = vector.shape_cast %14 : vector<8xf32> to vector<8x1xf32>
    %16 = tpu.reduce_index %13 {axis = 1 : i32, kind = #tpu.reduction_kind<arg_min>} : vector<8x256xf32> -> vector<8xi32>
    %17 = vector.shape_cast %16 : vector<8xi32> to vector<8x1xi32>
    %c256_i32 = arith.constant 256 : i32
    %18 = arith.muli %arg1, %c256_i32 : i32
    %19 = vector.broadcast %18 : i32 to vector<8x1xi32>
    %20 = arith.addi %17, %19 : vector<8x1xi32>
    %c0_8 = arith.constant 0 : index
    %c0_9 = arith.constant 0 : index
    %c0_10 = arith.constant 0 : index
    %21 = vector.load %arg5[%c0_8, %c0_9, %c0_10] : memref<1x8x1xf32, #tpu.memory_space<vmem>>, vector<1x8x1xf32>
    %22 = vector.shape_cast %21 : vector<1x8x1xf32> to vector<8x1xf32>
    %c0_11 = arith.constant 0 : index
    %c0_12 = arith.constant 0 : index
    %c0_13 = arith.constant 0 : index
    %23 = vector.load %arg4[%c0_11, %c0_12, %c0_13] : memref<1x8x1xi32, #tpu.memory_space<vmem>>, vector<1x8x1xi32>
    %24 = vector.shape_cast %23 : vector<1x8x1xi32> to vector<8x1xi32>
    %25 = arith.cmpf olt, %15, %22 : vector<8x1xf32>
    %26 = arith.select %25, %15, %22 : vector<8x1xi1>, vector<8x1xf32>
    %c0_14 = arith.constant 0 : index
    %c0_15 = arith.constant 0 : index
    %c0_16 = arith.constant 0 : index
    %27 = vector.load %arg5[%c0_14, %c0_15, %c0_16] : memref<1x8x1xf32, #tpu.memory_space<vmem>>, vector<1x8x1xf32>
    %28 = vector.shape_cast %27 : vector<1x8x1xf32> to vector<8x1xf32>
    %29 = vector.shape_cast %26 : vector<8x1xf32> to vector<1x8x1xf32>
    tpu.vector_store %arg5[%c0_14, %c0_15, %c0_16], %29 {strides = array<i32>} : memref<1x8x1xf32, #tpu.memory_space<vmem>>, vector<1x8x1xf32>,
    %30 = arith.select %25, %20, %24 : vector<8x1xi1>, vector<8x1xi32>
    %c0_17 = arith.constant 0 : index
    %c0_18 = arith.constant 0 : index
    %c0_19 = arith.constant 0 : index
    %31 = vector.load %arg4[%c0_17, %c0_18, %c0_19] : memref<1x8x1xi32, #tpu.memory_space<vmem>>, vector<1x8x1xi32>
    %32 = vector.shape_cast %31 : vector<1x8x1xi32> to vector<8x1xi32>
    %33 = vector.shape_cast %30 : vector<8x1xi32> to vector<1x8x1xi32>
    tpu.vector_store %arg4[%c0_17, %c0_18, %c0_19], %33 {strides = array<i32>} : memref<1x8x1xi32, #tpu.memory_space<vmem>>, vector<1x8x1xi32>,
    return
  }
  func.func @transform_0(%arg0: i32, %arg1: i32) -> (i32, i32) {
    %c0_i32 = arith.constant 0 : i32
    %c0_i32_0 = arith.constant 0 : i32
    %c0_i32_1 = arith.constant 0 : i32
    return %c0_i32, %c0_i32_0 : i32, i32
  }
  func.func @transform_1(%arg0: i32, %arg1: i32) -> (i32, i32, i32) {
    %c0_i32 = arith.constant 0 : i32
    %c0_i32_0 = arith.constant 0 : i32
    return %arg0, %c0_i32, %arg1 : i32, i32, i32
  }
  func.func @transform_2(%arg0: i32, %arg1: i32) -> (i32, i32, i32) {
    %c0_i32 = arith.constant 0 : i32
    %c0_i32_0 = arith.constant 0 : i32
    %c0_i32_1 = arith.constant 0 : i32
    return %arg0, %c0_i32, %c0_i32_0 : i32, i32, i32
  }
  func.func @transform_3(%arg0: i32, %arg1: i32) -> (i32, i32, i32) {
    %c0_i32 = arith.constant 0 : i32
    %c0_i32_0 = arith.constant 0 : i32
    %c0_i32_1 = arith.constant 0 : i32
    return %arg0, %c0_i32, %c0_i32_0 : i32, i32, i32
  }
}

</mosaic_0001>

<bundles_post_ra>
// kernel: precomputed_descriptor_net_forward.1
= control target key start
LH: loop header
LB: loop body
LE: loop exit
PB: predicated region body
PF: predicated region fallthrough
CT: control target
= control target key end

     0   :  { %s509_s12 = smov 0   ;;  %s511_s13 = smov 0   ;;  %s558_s0 = inlined_call_operand.vmem [shape: f32[8,32], index: 0, kind: input, shape index: {}]   ;;  %s559_s1 = inlined_call_operand.vmem [shape: f32[2,32,256], index: 1, kind: input, shape index: {}]   ;;  %s560_s2 = inlined_call_operand.vmem [shape: s32[2,8,1], index: 2, kind: output, shape index: {0}]   ;;  %s561_s3 = inlined_call_operand.vmem [shape: f32[2,8,1], index: 3, kind: output, shape index: {1}]  }
   0x1   :  { %s513_s14 = smov 0  }
   0x2 LB: > { %s26_s15 = sadd.s32 1, %s481_s13  ;;  %p425_p0 = scmp.ge.s32.totalorder %s485_s14, 1  ;;  %s485_s14 = sphi %s513_s14, %s14_s14   ;;  %s481_s13 = sphi %s511_s13, %s563_s13   ;;  %s477_s12 = sphi %s509_s12, %s562_s12  }
   0x3   : > { %p28_p1 = scmp.ge.s32.totalorder %s26_s15, 2  ;;  %p159_p2 = scmp.lt.s32.totalorder %s485_s14, 3 }
   0x5   : > { %s565_s15 = smov (%p28_p1, %s26_s15), 0  ;;  %p160_p3 = pnand %p425_p0, %p159_p2 }
   0x6   : > { %p191_p4 = scmp.lt.s32.totalorder (!%p160_p3), %s477_s12, 1 }
   0x7   : > { %163 = sbr.rel (%p160_p3) target bundleno = 396 (0x18c), region = 28 }
   0xc   : > { %s567_s12 = smov (!%p191_p4, %s477_s12), 1  ;;  %v215_v18 = vld [vmem:[%s558_s0] sm:$0xff]  ;;  %vm224_vm0 = vcmask 261120   ;;  %vm212_vm2 = vcmask 7168   ;;  %v487_v43 = vmov inf   ;;  %v488_v44 = vmov 0  }
   0xd   : > { %s434_s16 = sshll.u32 %s567_s12, 6  ;;  %s428_s22 = sshll.u32 %s567_s12, 3  ;;  %v301_v45 = vlaneseq }
   0xe   : > { %s198_s19 = scalar_lea.vmem %s559_s1, %s434_s16  ;;  %s207_s25 = scalar_lea.vmem %s561_s3, %s428_s22 }
   0xf   : > { %v222_v0 = vld [vmem:[%s198_s19 + $0x30] sm:$0xff]  ;;  %v223_v1 = vld [vmem:[%s198_s19 + $0x38] sm:$0xff]  ;;  %v220_v2 = vld [vmem:[%s198_s19 + $0x20] sm:$0xff]  ;;  %213 = vst.msk [vmem:[%s207_s25] sm:$0xff] %vm212_vm2, %v487_v43  ;;  %s203_s28 = scalar_lea.vmem %s560_s2, %s428_s22  ;;  %v302_v47 = vand.u32 127, %v301_v45 }
  0x10   : > { %240 = vmatpush.msra.mxu0 %v222_v0  ;;  %260 = vmatpush.msra.mxu1 %v223_v1  ;;  %v221_v3 = vld [vmem:[%s198_s19 + $0x28] sm:$0xff]  ;;  %v218_v4 = vld [vmem:[%s198_s19 + $0x10] sm:$0xff]  ;;  %v219_v5 = vld [vmem:[%s198_s19 + $0x18] sm:$0xff]  ;;  %v272_v6 = vmul.f32 %v220_v2, %v220_v2  ;;  %v274_v14 = vmul.f32 %v222_v0, %v222_v0  ;;  %v275_v15 = vmul.f32 %v223_v1, %v223_v1 }
  0x11   : > { %v270_v7 = vmul.f32 %v218_v4, %v218_v4  ;;  %v271_v8 = vmul.f32 %v219_v5, %v219_v5  ;;  %v216_v9 = vld [vmem:[%s198_s19] sm:$0xff]  ;;  %v217_v10 = vld [vmem:[%s198_s19 + $0x8] sm:$0xff]  ;;  %v273_v11 = vmul.f32 %v221_v3, %v221_v3  ;;  %214 = vst.msk [vmem:[%s203_s28] sm:$0xff] %vm212_vm2, %v488_v44  ;;  %v303_v48 = vadd.s32 128, %v302_v47 }
  0x12   : > { %241 = vmatpush.msra.mxu0 %v220_v2  ;;  %261 = vmatpush.msra.mxu1 %v221_v3  ;;  %v268_v12 = vmul.f32 %v216_v9, %v216_v9  ;;  %v269_v13 = vmul.f32 %v217_v10, %v217_v10 }
  0x14   : > { %242 = vmatpush.msra.mxu0 %v218_v4  ;;  %262 = vmatpush.msra.mxu1 %v219_v5  ;;  %v276_v16 = vadd.f32 %v270_v7, %v268_v12  ;;  %v285_v17 = vadd.f32 %v271_v8, %v269_v13 }
  0x16   : > { %243 = vmatpush.msra.mxu0 %v216_v9  ;;  %v277_v19 = vadd.f32 %v276_v16, %v272_v6  ;;  %263 = vmatpush.msra.mxu1 %v217_v10  ;;  %v286_v20 = vadd.f32 %v285_v17, %v273_v11  ;;  %v315_v49 = vld [vmem:[%s207_s25] sm:$0xff] }
  0x17   : > { %430 = vmatmul.msk.f32.vlgmr.msra.gmra.mxu0 %vm224_vm0, %v215_v18  ;;  %431 = vmatmul.msk.f32.vlgmr.msra.gmra.mxu1 %vm224_vm0, %v215_v18 }
  0x18   : > { %v278_v21 = vadd.f32 %v277_v19, %v274_v14  ;;  %v287_v22 = vadd.f32 %v286_v20, %v275_v15  ;;  %v316_v53 = vld [vmem:[%s203_s28] sm:$0xff] }
  0x1a   : > { %v279_v23 = vrot.slane %v278_v21, 4  ;;  %v288_v24 = vrot.slane %v287_v22, 4 }
  0x1c   : > { %v280_v25 = vadd.f32 %v279_v23, %v278_v21  ;;  %v289_v26 = vadd.f32 %v288_v24, %v287_v22 }
  0x1e   : > { %v281_v27 = vrot.slane %v280_v25, 2  ;;  %v290_v28 = vrot.slane %v289_v26, 2 }
  0x20   : > { %v282_v29 = vadd.f32 %v281_v27, %v280_v25  ;;  %v291_v30 = vadd.f32 %v290_v28, %v289_v26 }
  0x22   : > { %v283_v31 = vrot.slane %v282_v29, 1  ;;  %v292_v32 = vrot.slane %v291_v30, 1 }
  0x24   : > { %v284_v33 = vadd.f32 %v283_v31, %v282_v29  ;;  %v293_v34 = vadd.f32 %v292_v32, %v291_v30 }
  0x94   : > { %v245_v35 = vpop.f32.mrf.mxu0  ;;  %v265_v36 = vpop.f32.mrf.mxu1 }
  0x95   : > { %v294_v37 = vmul.f32 2.0, %v245_v35  ;;  %v295_v38 = vmul.f32 2.0, %v265_v36 }
  0x97   : > { %v296_v39 = vsub.f32 %v284_v33, %v294_v37  ;;  %v297_v40 = vsub.f32 %v293_v34, %v295_v38 }
  0x99   : > { %vm304_vm1 = vcmp.le.f32.partialorder %v296_v39, %v297_v40  ;;  %v298_v41 = vmin.f32 %v296_v39, %v297_v40 }
  0x9a   : > { %v305_v42 = vsel %vm304_vm1, %v296_v39, %v297_v40  ;;  %v306_v51 = vsel %vm304_vm1, %v302_v47, %v303_v48 }
  0x9b   : > { %307 = vmin.index.xlane.f32.xlu0 %v305_v42 }
  0xa3   : > { %299 = vmin.xlane.f32.xlu0 %v298_v41 }
 0x10e   : > { %v308_v46 = vpop.xlane.xlu0 %307 }
 0x10f   : > { %462 = vset.pattern.permute.xlu0 %v308_v46  ;;  %461 = vset.pattern.permute.xlu1 %v308_v46 }
 0x116   : > { %v300_v50 = vpop.xlane.xlu0 %299 }
 0x117   : > { %vm317_vm3 = vcmp.lt.f32.partialorder %v300_v50, %v315_v49  ;;  %310 = vperm.xlu1 %461, %v306_v51  }
 0x118   : > { %v318_v52 = vsel %vm317_vm3, %v300_v50, %v315_v49 }
 0x119   : > { %320 = vst.msk [vmem:[%s207_s25] sm:$0xff] %vm212_vm2, %v318_v52 }
 0x189   : > { %v311_v54 = vpop.permute.xlu1 %310 }
 0x18a   : > { %v321_v55 = vsel %vm317_vm3, %v311_v54, %v316_v53 }
 0x18b   : > { %322 = vst.msk [vmem:[%s203_s28] sm:$0xff] %vm212_vm2, %v321_v55 }
 0x18c PF: > { %s14_s14 = sadd.s32 1, %s485_s14   ;;  %s562_s12 = smov %s481_s13 }
 0x18d   : > { %p11_p5 = scmp.ge.s32.totalorder %s14_s14, 4   ;;  %s563_s13 = smov %s565_s15 }
 0x18f   :  { %13 = sbr.rel (!%p11_p5) target bundleno = 2 (0x2), region = 74 }

</bundles_post_ra>
